<compile_context>
chip_gen: v5e
topology: v5e:2x2
jax: 0.10.0
libtpu: 0.0.40
codegen_flags: <defaults>
</compile_context>

<pallas_src>
import math
import functools

import jax
import jax.numpy as jnp
from jax.experimental import pallas as pl
from jax.experimental.pallas import tpu as pltpu


# ---------------------------------------------------------------------------
# Sinusoidal table, identical to the PyTorch __init__ (buffer `pe`, squeezed).
# ---------------------------------------------------------------------------
def build_pe_table(d_model: int, max_len: int = 1024, scale_factor: float = 1.0,
                   dtype=jnp.float32) -> jnp.ndarray:
    position = jnp.arange(0, max_len, dtype=jnp.float32)[:, None]             # [L, 1]
    div_term = jnp.exp(jnp.arange(0, d_model, 2, dtype=jnp.float32)
                       * (-math.log(10000.0) / d_model))                       # [D/2]
    pe = jnp.zeros((max_len, d_model), dtype=jnp.float32)
    pe = pe.at[:, 0::2].set(jnp.sin(position * div_term))
    pe = pe.at[:, 1::2].set(jnp.cos(position * div_term))
    return (scale_factor * pe).astype(dtype)


# ---------------------------------------------------------------------------
# Kernel: pure elementwise add. The pe block either matches x's block shape
# exactly (2-D paths) or has a size-1 batch dim that broadcasts against the
# x block's sublane-mapped batch dim (3-D unaligned-D fallback).
# Keep strictly elementwise: padded tail rows read garbage pe rows, which is
# only safe because nothing reduces over / reuses them.
# ---------------------------------------------------------------------------
def _add_pe_kernel(x_ref, pe_ref, o_ref):
    o_ref[...] = x_ref[...] + pe_ref[...]


_TARGET_BLOCK_BYTES = 4 * 1024 * 1024    # ~4 MiB x-block: amortizes per-step overhead
                                         # on v7x; 3 specs x 2 bufs x 4 MiB = 24 MiB.
_VMEM_LIMIT_BYTES = 48 * 1024 * 1024     # explicit scoped-VMEM limit: > default on
                                         # v5e/v6e/v7x, < v7x's 64 MiB physical VMEM.


def _sublane_multiple(dtype) -> int:
    """Dtype-native sublane packing: 8 rows for 4-byte, 16 for 2-byte, 32 for 1-byte."""
    return max(8, 32 // jnp.dtype(dtype).itemsize)


def _tile_rows(n_rows: int, row_bytes: int, sublane: int,
               target_bytes: int = _TARGET_BLOCK_BYTES, min_steps: int = 1) -> int:
    """Largest sublane-multiple row count with one block <= target_bytes, clamped to
    the sublane-padded row extent; optionally capped so the seq axis yields at least
    `min_steps` grid steps (keeps both v7x TensorCores busy)."""
    padded = ((n_rows + sublane - 1) // sublane) * sublane
    rows = max(1, target_bytes // max(row_bytes, 1))
    rows = max(sublane, (rows // sublane) * sublane)
    rows = min(rows, padded)
    if min_steps > 1:
        cap = (padded // min_steps // sublane) * sublane
        if cap >= sublane:
            rows = min(rows, cap)
    return int(rows)


@functools.partial(jax.jit, static_argnames=("batch_first", "donate"))
def fixed_positional_encoding(x: jnp.ndarray, pe: jnp.ndarray,
                              batch_first: bool = False,
                              donate: bool = False) -> jnp.ndarray:
    """x: [S, B, D] (batch_first=False) or [B, S, D] (batch_first=True).
    pe: full precomputed table [max_len, D]. Returns same shape/layout as x.
    donate=True aliases the output onto x's buffer (only if the caller donates x)."""
    pe = pe.astype(x.dtype)  # match activation dtype (halves pe DMA for bf16)
    itemsize = jnp.dtype(x.dtype).itemsize
    sub = _sublane_multiple(x.dtype)
    io_alias = {0: 0} if donate else {}

    if batch_first:
        # Operate directly on [B, S, D]; batch dim squeezed out of the block.
        # Grid: sequence OUTER, batch INNER -> pe block index unchanged for B
        # consecutive steps, so the pipeline skips re-DMA of the pe tile.
        B, S, D = x.shape
        min_steps = 1 if B >= 2 else 2
        ts = _tile_rows(S, D * itemsize, sub, min_steps=min_steps)
        grid = (pl.cdiv(S, ts), B)
        return pl.pallas_call(
            _add_pe_kernel,
            out_shape=jax.ShapeDtypeStruct((B, S, D), x.dtype),
            grid_spec=pltpu.PrefetchScalarGridSpec(
                num_scalar_prefetch=0,
                grid=grid,
                in_specs=[
                    pl.BlockSpec((None, ts, D), lambda s, b: (b, s, 0)),
                    pl.BlockSpec((ts, D), lambda s, b: (s, 0)),   # reused across b
                ],
                out_specs=pl.BlockSpec((None, ts, D), lambda s, b: (b, s, 0)),
            ),
            compiler_params=pltpu.CompilerParams(
                dimension_semantics=("parallel", "parallel"),
                vmem_limit_bytes=_VMEM_LIMIT_BYTES),
            input_output_aliases=io_alias,
        )(x, pe)

    # batch_first=False: x is [S, B, D].
    S, B, D = x.shape

    if D % 128 == 0:
        # Lane-aligned embed dim: free 2-D view [S, B*D], per-batch column blocks via
        # the inner grid axis; pe indexed only by the sequence axis -> no replication.
        x2 = x.reshape(S, B * D)
        min_steps = 1 if B >= 2 else 2
        ts = _tile_rows(S, D * itemsize, sub, min_steps=min_steps)
        grid = (pl.cdiv(S, ts), B)
        out2 = pl.pallas_call(
            _add_pe_kernel,
            out_shape=jax.ShapeDtypeStruct((S, B * D), x.dtype),
            grid_spec=pltpu.PrefetchScalarGridSpec(
                num_scalar_prefetch=0,
                grid=grid,
                in_specs=[
                    pl.BlockSpec((ts, D), lambda i, b: (i, b)),
                    pl.BlockSpec((ts, D), lambda i, b: (i, 0)),   # reused across b
                ],
                out_specs=pl.BlockSpec((ts, D), lambda i, b: (i, b)),
            ),
            compiler_params=pltpu.CompilerParams(
                dimension_semantics=("parallel", "parallel"),
                vmem_limit_bytes=_VMEM_LIMIT_BYTES),
            input_output_aliases=io_alias,
        )(x2, pe)
        return out2.reshape(S, B, D)

    # Small / unaligned D (e.g. demo D=32): a (ts, D) column block of a [S, B*D] view
    # would violate the (8,128)/full-dim block rule, so run on the 3-D layout with
    # full (B, D) trailing dims and broadcast pe (ts, 1, D) across the batch/sublane
    # dim in-kernel. No HBM-materialized pe replication. Toy-shape path: lane width
    # D < 128 lowers to masked stores; acceptable here.
    pe3 = pe.reshape(pe.shape[0], 1, D)
    ts = _tile_rows(S, B * D * itemsize, sub, min_steps=2)
    grid = (pl.cdiv(S, ts),)
    return pl.pallas_call(
        _add_pe_kernel,
        out_shape=jax.ShapeDtypeStruct((S, B, D), x.dtype),
        grid_spec=pltpu.PrefetchScalarGridSpec(
            num_scalar_prefetch=0,
            grid=grid,
            in_specs=[
                pl.BlockSpec((ts, B, D), lambda i: (i, 0, 0)),
                pl.BlockSpec((ts, 1, D), lambda i: (i, 0, 0)),
            ],
            out_specs=pl.BlockSpec((ts, B, D), lambda i: (i, 0, 0)),
        ),
        compiler_params=pltpu.CompilerParams(
            dimension_semantics=("parallel",),
            vmem_limit_bytes=_VMEM_LIMIT_BYTES),
        input_output_aliases=io_alias,
    )(x, pe3)


if __name__ == "__main__":
    # Small shapes: seq=8, batch=2, embed(d_model)=32, max_len=1024
    d_model, max_len, scale_factor = 32, 1024, 1.0
    S, B = 8, 2

    key = jax.random.PRNGKey(0)
    x = jax.random.normal(key, (S, B, d_model), dtype=jnp.float32)
    pe = build_pe_table(d_model, max_len, scale_factor)

    # 1) batch_first=False, unaligned D=32 -> 3-D broadcast fallback (no pe tiling in HBM).
    out = jax.block_until_ready(fixed_positional_encoding(x, pe, batch_first=False))
    ref = x + pe[:S][:, None, :]
    assert out.shape == (S, B, d_model)
    assert jnp.allclose(out, ref, atol=1e-6), "mismatch (batch_first=False)"

    # 2) batch_first=True on [B, S, D]; batch is the INNER grid axis so the pe tile
    #    is DMA'd once per sequence tile rather than once per (batch, tile).
    x_bf = jnp.transpose(x, (1, 0, 2))
    out_bf = jax.block_until_ready(
        fixed_positional_encoding(x_bf, pe, batch_first=True))
    assert out_bf.shape == (B, S, d_model)
    assert jnp.allclose(out_bf, jnp.transpose(ref, (1, 0, 2)), atol=1e-6), \
        "mismatch (batch_first=True)"

    # 3) Ragged sequence length (padded tail block) + aliased output buffer.
    S2 = 20
    x_tail = jax.random.normal(jax.random.PRNGKey(1), (S2, B, d_model),
                               dtype=jnp.float32)
    out_tail = jax.block_until_ready(
        fixed_positional_encoding(x_tail, pe, batch_first=False, donate=True))
    ref_tail = x_tail + pe[:S2][:, None, :]
    assert jnp.allclose(out_tail, ref_tail, atol=1e-6), "mismatch (ragged tail)"

    # 4) Lane-aligned embed dim (D % 128 == 0): per-batch column grid, pe reused
    #    across the inner batch axis.
    D2 = 128
    pe2 = build_pe_table(D2, max_len, scale_factor)
    x_al = jax.random.normal(jax.random.PRNGKey(2), (S, B, D2), dtype=jnp.float32)
    out_al = jax.block_until_ready(
        fixed_positional_encoding(x_al, pe2, batch_first=False))
    ref_al = x_al + pe2[:S][:, None, :]
    assert jnp.allclose(out_al, ref_al, atol=1e-6), "mismatch (aligned D)"

    print("KERNEL_OK")
</pallas_src>

<mosaic_0001>
module attributes {stable_mosaic.version = 11 : i64} {
  func.func @_add_pe_kernel(%arg0: i32, %arg1: memref<8x2x32xf32, #tpu.memory_space<vmem>>, %arg2: memref<8x1x32xf32, #tpu.memory_space<vmem>>, %arg3: memref<8x2x32xf32, #tpu.memory_space<vmem>>) attributes {dimension_semantics = [#tpu.dimension_semantics<parallel>], iteration_bounds = array<i64: 1>, scalar_prefetch = 0 : i64, scratch_operands = 0 : i64, tpu.core_type = #tpu.core_type<tc>, window_params = [{transform_indices = @transform_0, window_bounds = array<i64: 8, 2, 32>}, {transform_indices = @transform_1, window_bounds = array<i64: 8, 1, 32>}, {transform_indices = @transform_2, window_bounds = array<i64: 8, 2, 32>}]} {
    %c0 = arith.constant 0 : index
    %c0_0 = arith.constant 0 : index
    %c0_1 = arith.constant 0 : index
    %0 = vector.load %arg1[%c0, %c0_0, %c0_1] : memref<8x2x32xf32, #tpu.memory_space<vmem>>, vector<8x2x32xf32>
    %c0_2 = arith.constant 0 : index
    %c0_3 = arith.constant 0 : index
    %c0_4 = arith.constant 0 : index
    %1 = vector.load %arg2[%c0_2, %c0_3, %c0_4] : memref<8x1x32xf32, #tpu.memory_space<vmem>>, vector<8x1x32xf32>
    %2 = vector.broadcast %1 : vector<8x1x32xf32> to vector<8x2x32xf32>
    %3 = arith.addf %0, %2 : vector<8x2x32xf32>
    %c0_5 = arith.constant 0 : index
    %c0_6 = arith.constant 0 : index
    %c0_7 = arith.constant 0 : index
    %4 = vector.load %arg3[%c0_5, %c0_6, %c0_7] : memref<8x2x32xf32, #tpu.memory_space<vmem>>, vector<8x2x32xf32>
    tpu.vector_store %arg3[%c0_5, %c0_6, %c0_7], %3 {strides = array<i32>} : memref<8x2x32xf32, #tpu.memory_space<vmem>>, vector<8x2x32xf32>,
    return
  }
  func.func @transform_0(%arg0: i32) -> (i32, i32, i32) {
    %c0_i32 = arith.constant 0 : i32
    %c0_i32_0 = arith.constant 0 : i32
    %c0_i32_1 = arith.constant 0 : i32
    return %arg0, %c0_i32, %c0_i32_0 : i32, i32, i32
  }
  func.func @transform_1(%arg0: i32) -> (i32, i32, i32) {
    %c0_i32 = arith.constant 0 : i32
    %c0_i32_0 = arith.constant 0 : i32
    %c0_i32_1 = arith.constant 0 : i32
    return %arg0, %c0_i32, %c0_i32_0 : i32, i32, i32
  }
  func.func @transform_2(%arg0: i32) -> (i32, i32, i32) {
    %c0_i32 = arith.constant 0 : i32
    %c0_i32_0 = arith.constant 0 : i32
    %c0_i32_1 = arith.constant 0 : i32
    return %arg0, %c0_i32, %c0_i32_0 : i32, i32, i32
  }
}

</mosaic_0001>

<bundles_post_ra>
// kernel: fixed_positional_encoding.1
= control target key start
LH: loop header
LB: loop body
LE: loop exit
PB: predicated region body
PF: predicated region fallthrough
CT: control target
= control target key end

     0   :  { %vm60_vm0 = vcmask 254976   ;;  %s201_s0 = inlined_call_operand.vmem [shape: f32[8,2,32], index: 0, kind: input, shape index: {}]   ;;  %s202_s1 = inlined_call_operand.vmem [shape: f32[1024,1,32], index: 1, kind: input, shape index: {}]   ;;  %s203_s2 = inlined_call_operand.hbm [shape: f32[8,2,32], index: 2, kind: output, shape index: {}]  }
   0x1   :  { %v12_v0 = vld [vmem:[%s201_s0] sm:$0x3]  ;;  %v13_v2 = vld [vmem:[%s201_s0 + $0x2] sm:$0x3]  ;;  %v14_v5 = vld [vmem:[%s201_s0 + $0x4] sm:$0x3] }
   0x2   :  { %v90_v1 = vld [vmem:[%s202_s1] ss:$0 sm:$0xff]  ;;  %v91_v4 = vld [vmem:[%s202_s1 + $0x1] ss:$0 sm:$0xff]  ;;  %v92_v6 = vld [vmem:[%s202_s1 + $0x2] ss:$0 sm:$0xff] }
   0x3   :  { %v52_v3 = vadd.f32 %v90_v1, %v12_v0  ;;  %v15_v7 = vld [vmem:[%s201_s0 + $0x6] sm:$0x3]  ;;  %v53_v8 = vadd.f32 %v91_v4, %v13_v2  ;;  %v93_v9 = vld [vmem:[%s202_s1 + $0x3] ss:$0 sm:$0xff]  ;;  %v16_v10 = vld [vmem:[%s201_s0 + $0x8] sm:$0x3]  ;;  %v54_v11 = vadd.f32 %v92_v6, %v14_v5 }
   0x4   :  { %v94_v12 = vld [vmem:[%s202_s1 + $0x4] ss:$0 sm:$0xff]  ;;  %v17_v13 = vld [vmem:[%s201_s0 + $0xa] sm:$0x3]  ;;  %v55_v14 = vadd.f32 %v93_v9, %v15_v7  ;;  %v95_v15 = vld [vmem:[%s202_s1 + $0x5] ss:$0 sm:$0xff] }
   0x5   :  { %61 = vst.msk [vmem:[#allocation2] sm:$0x3] %vm60_vm0, %v52_v3  ;;  %v56_v16 = vadd.f32 %v94_v12, %v16_v10  ;;  %v18_v17 = vld [vmem:[%s201_s0 + $0xc] sm:$0x3]  ;;  %v57_v18 = vadd.f32 %v95_v15, %v17_v13  ;;  %v96_v19 = vld [vmem:[%s202_s1 + $0x6] ss:$0 sm:$0xff] }
   0x6   :  { %62 = vst.msk [vmem:[#allocation2 + $0x2] sm:$0x3] %vm60_vm0, %v53_v8  ;;  %v19_v20 = vld [vmem:[%s201_s0 + $0xe] sm:$0x3]  ;;  %v97_v21 = vld [vmem:[%s202_s1 + $0x7] ss:$0 sm:$0xff]  ;;  %v58_v22 = vadd.f32 %v96_v19, %v18_v17 }
   0x7   :  { %63 = vst.msk [vmem:[#allocation2 + $0x4] sm:$0x3] %vm60_vm0, %v54_v11 }
   0x8   :  { %64 = vst.msk [vmem:[#allocation2 + $0x6] sm:$0x3] %vm60_vm0, %v55_v14 }
   0x9   :  { %65 = vst.msk [vmem:[#allocation2 + $0x8] sm:$0x3] %vm60_vm0, %v56_v16 }
   0xa   :  { %66 = vst.msk [vmem:[#allocation2 + $0xa] sm:$0x3] %vm60_vm0, %v57_v18 }
   0xb   :  { %7 = vsyncpa [#allocation3], 0  ;;  %s124_s13 = smov [#allocation2]   ;;  %s75_s17 = sshll.u32 %s203_s2, 4  ;;  %v59_v23 = vadd.f32 %v97_v21, %v19_v20  ;;  %67 = vst.msk [vmem:[#allocation2 + $0xc] sm:$0x3] %vm60_vm0, %v58_v22  ;;  %s76_s17 = int_to_ptr.hbm [resolvable:$true] %s75_s17 }
   0xc   :  { %s73_s14 = sshll.u32 %s124_s13, 4  ;;  %s125_s0 = smov 32   ;;  %s74_s14 = int_to_ptr.vmem [resolvable:$true] %s73_s14 }
   0xd   :  { %68 = vst.msk [vmem:[#allocation2 + $0xe] sm:$0x3] %vm60_vm0, %v59_v23  ;;  %s126_s18 = smov 2  }
   0xe   :  { %81 = dma.vmem_to_hbm [thread:$0]  %s74_s14, 256, %s76_s17, [#allocation3], %s125_s0, %s125_s0, %s126_s18  }
   0xf   :  { %122 = dma.done.wait [#allocation3], 256  }
  0x10   :  { %123 = vsyncadd [#allocation3], 4294967040 }
  0x11   :  { %86 = vsyncpa [#allocation3], 1 }

</bundles_post_ra>
